<compile_context>
chip_gen: v7x
topology: tpu7x:2x2x1
jax: 0.10.0
libtpu: 0.0.40
codegen_flags: <defaults>
</compile_context>

<pallas_src>
import functools

import jax
import jax.numpy as jnp
from jax import lax
from jax.experimental import pallas as pl
from jax.experimental.pallas import tpu as pltpu

LANES = 128


def _dice_stats_kernel(score_ref, tgt_ref, out_ref, *,
                       n_classes, hw_total, tile_hw, softmax):
    """Grid = (N, hw_tiles).  Per n, accumulate per-class (intersect, y, z).

    score_ref: (1, C, TILE_HW)  logits / probs (any float dtype)
    tgt_ref:   (1, 1, TILE_HW)  int32 class labels
    out_ref:   (1, C, 128)      f32; lane 0 = intersect, 1 = y_sum, 2 = z_sum
    """
    j = pl.program_id(1)

    @pl.when(j == 0)
    def _init():
        out_ref[...] = jnp.zeros_like(out_ref)

    x = score_ref[0].astype(jnp.float32)          # (C, TILE_HW)
    t = tgt_ref[0]                                # (1, TILE_HW) int32

    # Mask for the ragged tail of the last tile (replaces wrapper-side padding).
    pos = lax.broadcasted_iota(jnp.int32, (n_classes, tile_hw), 1)
    valid = (pos + j * tile_hw) < hw_total        # (C, TILE_HW) bool

    if softmax:
        # Fused softmax over the class axis (axis 0 of the squeezed block).
        x = jnp.where(valid, x, 0.0)
        x = x - jnp.max(x, axis=0, keepdims=True)
        ex = jnp.exp(x)
        x = ex / jnp.sum(ex, axis=0, keepdims=True)

    s = jnp.where(valid, x, 0.0)                  # (C, TILE_HW) f32, tail = 0

    # In-kernel one-hot: compare int32 labels against the class index (iota).
    cls = lax.broadcasted_iota(jnp.int32, (n_classes, tile_hw), 0)
    onehot = jnp.where(jnp.logical_and(valid, t == cls), 1.0, 0.0)

    intersect = jnp.sum(s * onehot, axis=-1, keepdims=True)   # (C, 1)
    y_sum = jnp.sum(onehot, axis=-1, keepdims=True)           # (C, 1)  (1*1 == 1)
    z_sum = jnp.sum(s * s, axis=-1, keepdims=True)            # (C, 1)

    # Pack the three per-class partials into lanes 0/1/2 of a lane-dense block.
    col = lax.broadcasted_iota(jnp.int32, (n_classes, LANES), 1)
    packed = (jnp.where(col == 0, intersect, 0.0)
              + jnp.where(col == 1, y_sum, 0.0)
              + jnp.where(col == 2, z_sum, 0.0))
    out_ref[0] += packed


def _choose_tile_hw(hw, n_classes, score_itemsize):
    """Largest TILE_HW (multiple of 128, or == hw) whose double-buffered input
    blocks fit a ~8 MiB VMEM budget (class dim padded to a sublane multiple)."""
    c_sl = -(-n_classes // 8) * 8                       # sublane-padded class dim
    bytes_per_col = 2 * (c_sl * score_itemsize + 8 * 4)  # 2x-buffered score + tgt
    budget = 8 * 1024 * 1024
    max_elems = max(budget // bytes_per_col, LANES)
    max_elems = min(max_elems, 1024 * LANES)            # cap at 1024 x 128 tiles
    if hw <= max_elems:
        return hw, 1
    tile = (max_elems // LANES) * LANES
    return tile, -(-hw // tile)


def dice_loss(inputs, target, n_classes, weight=None, softmax=False):
    """Pallas implementation of DiceLoss.forward (onehot=True path).

    inputs: (N, C, H, W) float logits/probs;  target: (N, 1, H, W) class labels.
    Returns scalar float32 loss = sum_c weight[c] * dice_c / n_classes.
    """
    N, C, H, W = inputs.shape
    assert C == n_classes, "channel dim must equal n_classes"
    assert target.shape == (N, 1, H, W), "predict & target shape do not match"
    HW = H * W

    # Native-layout views only (no transpose, no pad, no forced f32 copy).
    score = inputs.reshape(N, C, HW)
    tgt = target.reshape(N, 1, HW).astype(jnp.int32)

    tile_hw, n_tiles = _choose_tile_hw(HW, C, jnp.dtype(score.dtype).itemsize)

    kernel = functools.partial(
        _dice_stats_kernel, n_classes=C, hw_total=HW,
        tile_hw=tile_hw, softmax=bool(softmax))

    stats = pl.pallas_call(
        kernel,
        out_shape=jax.ShapeDtypeStruct((N, C, LANES), jnp.float32),
        grid_spec=pltpu.PrefetchScalarGridSpec(
            num_scalar_prefetch=0,
            grid=(N, n_tiles),
            in_specs=[
                pl.BlockSpec((1, C, tile_hw), lambda n, j: (n, 0, j)),
                pl.BlockSpec((1, 1, tile_hw), lambda n, j: (n, 0, j)),
            ],
            out_specs=pl.BlockSpec((1, C, LANES), lambda n, j: (n, 0, 0)),
        ),
        compiler_params=pltpu.CompilerParams(
            dimension_semantics=("parallel", "arbitrary"),
            vmem_limit_bytes=32 * 1024 * 1024),
    )(score, tgt)

    stats = jnp.sum(stats, axis=0)            # (C, 128) — reduce the parallel N axis
    intersect = stats[:, 0]
    y_sum = stats[:, 1]
    z_sum = stats[:, 2]

    smooth = 1e-5
    dice = 1.0 - (2.0 * intersect + smooth) / (z_sum + y_sum + smooth)

    if weight is None:
        weight = jnp.ones((n_classes,), jnp.float32)
    else:
        weight = jnp.asarray(weight, jnp.float32)
    # TODO(synk): onehot=False path (target already given as (N, C, H, W) soft
    # labels) is not wired into the kernel.
    return jnp.sum(dice * weight) / n_classes


def dice_loss_ref(inputs, target, n_classes, weight=None, softmax=False):
    """Plain-JAX reference matching the PyTorch module exactly."""
    if softmax:
        inputs = jax.nn.softmax(inputs, axis=1)
    labels = target[:, 0].astype(jnp.float32)                    # (N, H, W)
    onehot = (labels[:, None] ==
              jnp.arange(n_classes, dtype=jnp.float32)[None, :, None, None]
              ).astype(jnp.float32)                              # (N, C, H, W)
    smooth = 1e-5
    if weight is None:
        weight = [1.0] * n_classes
    loss = 0.0
    for i in range(n_classes):
        s = inputs[:, i].astype(jnp.float32)
        t = onehot[:, i]
        intersect = jnp.sum(s * t)
        y_sum = jnp.sum(t * t)
        z_sum = jnp.sum(s * s)
        dice = 1.0 - (2.0 * intersect + smooth) / (z_sum + y_sum + smooth)
        loss = loss + dice * weight[i]
    return loss / n_classes


if __name__ == "__main__":
    key = jax.random.PRNGKey(0)
    k1, k2 = jax.random.split(key)

    N, C, H, W = 2, 4, 16, 16
    inputs = jax.random.normal(k1, (N, C, H, W), dtype=jnp.float32)
    target = jax.random.randint(k2, (N, 1, H, W), 0, C, dtype=jnp.int32)

    # softmax=True path (fused in-kernel softmax).
    out1 = jax.block_until_ready(dice_loss(inputs, target, n_classes=C, softmax=True))
    ref1 = dice_loss_ref(inputs, target, n_classes=C, softmax=True)
    assert jnp.allclose(out1, ref1, rtol=1e-4, atol=1e-5), (out1, ref1)

    # softmax=False path with per-class weights.
    w = [1.0, 2.0, 0.5, 1.0]
    out2 = jax.block_until_ready(dice_loss(inputs, target, n_classes=C,
                                           weight=w, softmax=False))
    ref2 = dice_loss_ref(inputs, target, n_classes=C, weight=w, softmax=False)
    assert jnp.allclose(out2, ref2, rtol=1e-5, atol=1e-6), (out2, ref2)

    print("KERNEL_OK")
</pallas_src>

<mosaic_0001>
module attributes {stable_mosaic.version = 11 : i64} {
  func.func @_dice_stats_kernel(%arg0: i32, %arg1: i32, %arg2: memref<1x4x256xf32, #tpu.memory_space<vmem>>, %arg3: memref<1x1x256xi32, #tpu.memory_space<vmem>>, %arg4: memref<1x4x128xf32, #tpu.memory_space<vmem>>) attributes {dimension_semantics = [#tpu.dimension_semantics<parallel>, #tpu.dimension_semantics<arbitrary>], iteration_bounds = array<i64: 2, 1>, scalar_prefetch = 0 : i64, scratch_operands = 0 : i64, tpu.core_type = #tpu.core_type<tc>, window_params = [{transform_indices = @transform_0, window_bounds = array<i64: 1, 4, 256>}, {transform_indices = @transform_1, window_bounds = array<i64: 1, 1, 256>}, {transform_indices = @transform_2, window_bounds = array<i64: 1, 4, 128>}]} {
    %c0_i32 = arith.constant 0 : i32
    %0 = arith.cmpi eq, %arg1, %c0_i32 : i32
    %1 = arith.extui %0 : i1 to i32
    %c0_i32_0 = arith.constant 0 : i32
    %2 = arith.cmpi ne, %1, %c0_i32_0 : i32
    scf.if %2 {
      %cst_25 = arith.constant 0.000000e+00 : f32
      %68 = vector.broadcast %cst_25 : f32 to vector<1x4x128xf32>
      %c0_26 = arith.constant 0 : index
      %c0_27 = arith.constant 0 : index
      %c0_28 = arith.constant 0 : index
      %69 = vector.load %arg4[%c0_26, %c0_27, %c0_28] : memref<1x4x128xf32, #tpu.memory_space<vmem>>, vector<1x4x128xf32>
      tpu.vector_store %arg4[%c0_26, %c0_27, %c0_28], %68 {strides = array<i32>} : memref<1x4x128xf32, #tpu.memory_space<vmem>>, vector<1x4x128xf32>,
    } else {
    }
    %c0 = arith.constant 0 : index
    %c0_1 = arith.constant 0 : index
    %c0_2 = arith.constant 0 : index
    %3 = vector.load %arg2[%c0, %c0_1, %c0_2] : memref<1x4x256xf32, #tpu.memory_space<vmem>>, vector<1x4x256xf32>
    %4 = vector.shape_cast %3 : vector<1x4x256xf32> to vector<4x256xf32>
    %c0_3 = arith.constant 0 : index
    %c0_4 = arith.constant 0 : index
    %c0_5 = arith.constant 0 : index
    %5 = vector.load %arg3[%c0_3, %c0_4, %c0_5] : memref<1x1x256xi32, #tpu.memory_space<vmem>>, vector<1x1x256xi32>
    %6 = vector.shape_cast %5 : vector<1x1x256xi32> to vector<1x256xi32>
    %7 = tpu.iota {dimensions = array<i32: 1>} : vector<4x256xi32>
    %c256_i32 = arith.constant 256 : i32
    %8 = arith.muli %arg1, %c256_i32 : i32
    %9 = vector.broadcast %8 : i32 to vector<4x256xi32>
    %10 = arith.addi %7, %9 : vector<4x256xi32>
    %c256_i32_6 = arith.constant 256 : i32
    %11 = vector.broadcast %c256_i32_6 : i32 to vector<4x256xi32>
    %12 = arith.cmpi slt, %10, %11 : vector<4x256xi32>
    %cst = arith.constant 0.000000e+00 : f32
    %13 = vector.broadcast %cst : f32 to vector<4x256xf32>
    %14 = arith.select %12, %4, %13 : vector<4x256xi1>, vector<4x256xf32>
    %cst_7 = arith.constant dense<0xFF800000> : vector<256xf32>
    %15 = vector.multi_reduction <maximumf>, %14, %cst_7 [0] : vector<4x256xf32> to vector<256xf32>
    %16 = vector.shape_cast %15 : vector<256xf32> to vector<1x256xf32>
    %17 = vector.broadcast %16 : vector<1x256xf32> to vector<4x256xf32>
    %18 = arith.subf %14, %17 : vector<4x256xf32>
    %19 = math.exp %18 : vector<4x256xf32>
    %cst_8 = arith.constant dense<0.000000e+00> : vector<256xf32>
    %20 = vector.multi_reduction <add>, %19, %cst_8 [0] : vector<4x256xf32> to vector<256xf32>
    %21 = vector.shape_cast %20 : vector<256xf32> to vector<1x256xf32>
    %22 = vector.broadcast %21 : vector<1x256xf32> to vector<4x256xf32>
    %23 = arith.divf %19, %22 : vector<4x256xf32>
    %cst_9 = arith.constant 0.000000e+00 : f32
    %24 = vector.broadcast %cst_9 : f32 to vector<4x256xf32>
    %25 = arith.select %12, %23, %24 : vector<4x256xi1>, vector<4x256xf32>
    %26 = tpu.iota {dimensions = array<i32: 0>} : vector<4x256xi32>
    %27 = vector.broadcast %6 : vector<1x256xi32> to vector<4x256xi32>
    %28 = arith.cmpi eq, %27, %26 : vector<4x256xi32>
    %29 = arith.andi %12, %28 : vector<4x256xi1>
    %cst_10 = arith.constant 1.000000e+00 : f32
    %cst_11 = arith.constant 0.000000e+00 : f32
    %30 = vector.broadcast %cst_10 : f32 to vector<4x256xf32>
    %31 = vector.broadcast %cst_11 : f32 to vector<4x256xf32>
    %32 = arith.select %29, %30, %31 : vector<4x256xi1>, vector<4x256xf32>
    %33 = arith.mulf %25, %32 : vector<4x256xf32>
    %cst_12 = arith.constant dense<0.000000e+00> : vector<4xf32>
    %34 = vector.multi_reduction <add>, %33, %cst_12 [1] : vector<4x256xf32> to vector<4xf32>
    %35 = vector.shape_cast %34 : vector<4xf32> to vector<4x1xf32>
    %cst_13 = arith.constant dense<0.000000e+00> : vector<4xf32>
    %36 = vector.multi_reduction <add>, %32, %cst_13 [1] : vector<4x256xf32> to vector<4xf32>
    %37 = vector.shape_cast %36 : vector<4xf32> to vector<4x1xf32>
    %38 = arith.mulf %25, %25 : vector<4x256xf32>
    %cst_14 = arith.constant dense<0.000000e+00> : vector<4xf32>
    %39 = vector.multi_reduction <add>, %38, %cst_14 [1] : vector<4x256xf32> to vector<4xf32>
    %40 = vector.shape_cast %39 : vector<4xf32> to vector<4x1xf32>
    %41 = tpu.iota {dimensions = array<i32: 1>} : vector<4x128xi32>
    %c0_i32_15 = arith.constant 0 : i32
    %42 = vector.broadcast %c0_i32_15 : i32 to vector<4x128xi32>
    %43 = arith.cmpi eq, %41, %42 : vector<4x128xi32>
    %cst_16 = arith.constant 0.000000e+00 : f32
    %44 = vector.shape_cast %35 : vector<4x1xf32> to vector<4x1xf32>
    %45 = vector.broadcast %44 : vector<4x1xf32> to vector<4x128xf32>
    %46 = vector.broadcast %cst_16 : f32 to vector<4x128xf32>
    %47 = arith.select %43, %45, %46 : vector<4x128xi1>, vector<4x128xf32>
    %c1_i32 = arith.constant 1 : i32
    %48 = vector.broadcast %c1_i32 : i32 to vector<4x128xi32>
    %49 = arith.cmpi eq, %41, %48 : vector<4x128xi32>
    %cst_17 = arith.constant 0.000000e+00 : f32
    %50 = vector.shape_cast %37 : vector<4x1xf32> to vector<4x1xf32>
    %51 = vector.broadcast %50 : vector<4x1xf32> to vector<4x128xf32>
    %52 = vector.broadcast %cst_17 : f32 to vector<4x128xf32>
    %53 = arith.select %49, %51, %52 : vector<4x128xi1>, vector<4x128xf32>
    %54 = arith.addf %47, %53 : vector<4x128xf32>
    %c2_i32 = arith.constant 2 : i32
    %55 = vector.broadcast %c2_i32 : i32 to vector<4x128xi32>
    %56 = arith.cmpi eq, %41, %55 : vector<4x128xi32>
    %cst_18 = arith.constant 0.000000e+00 : f32
    %57 = vector.shape_cast %40 : vector<4x1xf32> to vector<4x1xf32>
    %58 = vector.broadcast %57 : vector<4x1xf32> to vector<4x128xf32>
    %59 = vector.broadcast %cst_18 : f32 to vector<4x128xf32>
    %60 = arith.select %56, %58, %59 : vector<4x128xi1>, vector<4x128xf32>
    %61 = arith.addf %54, %60 : vector<4x128xf32>
    %c0_19 = arith.constant 0 : index
    %c0_20 = arith.constant 0 : index
    %c0_21 = arith.constant 0 : index
    %62 = vector.load %arg4[%c0_19, %c0_20, %c0_21] : memref<1x4x128xf32, #tpu.memory_space<vmem>>, vector<1x4x128xf32>
    %63 = vector.shape_cast %62 : vector<1x4x128xf32> to vector<4x128xf32>
    %64 = arith.addf %63, %61 : vector<4x128xf32>
    %c0_22 = arith.constant 0 : index
    %c0_23 = arith.constant 0 : index
    %c0_24 = arith.constant 0 : index
    %65 = vector.load %arg4[%c0_22, %c0_23, %c0_24] : memref<1x4x128xf32, #tpu.memory_space<vmem>>, vector<1x4x128xf32>
    %66 = vector.shape_cast %65 : vector<1x4x128xf32> to vector<4x128xf32>
    %67 = vector.shape_cast %64 : vector<4x128xf32> to vector<1x4x128xf32>
    tpu.vector_store %arg4[%c0_22, %c0_23, %c0_24], %67 {strides = array<i32>} : memref<1x4x128xf32, #tpu.memory_space<vmem>>, vector<1x4x128xf32>,
    return
  }
  func.func @transform_0(%arg0: i32, %arg1: i32) -> (i32, i32, i32) {
    %c0_i32 = arith.constant 0 : i32
    %c0_i32_0 = arith.constant 0 : i32
    return %arg0, %c0_i32, %arg1 : i32, i32, i32
  }
  func.func @transform_1(%arg0: i32, %arg1: i32) -> (i32, i32, i32) {
    %c0_i32 = arith.constant 0 : i32
    %c0_i32_0 = arith.constant 0 : i32
    return %arg0, %c0_i32, %arg1 : i32, i32, i32
  }
  func.func @transform_2(%arg0: i32, %arg1: i32) -> (i32, i32, i32) {
    %c0_i32 = arith.constant 0 : i32
    %c0_i32_0 = arith.constant 0 : i32
    %c0_i32_1 = arith.constant 0 : i32
    return %arg0, %c0_i32, %c0_i32_0 : i32, i32, i32
  }
}

</mosaic_0001>

<bundles_post_ra>
// kernel: tpu_custom_call.1
= control target key start
LH: loop header
LB: loop body
LE: loop exit
PB: predicated region body
PF: predicated region fallthrough
CT: control target
= control target key end

     0   :  { %7 = vsyncpa [#allocation3], 0  ;;  %s948_s0 = inlined_call_operand.hbm [shape: f32[2,4,256], index: 0, kind: input, shape index: {}]   ;;  %s949_s1 = inlined_call_operand.hbm [shape: s32[2,1,256], index: 1, kind: input, shape index: {}]   ;;  %s950_s2 = inlined_call_operand.hbm [shape: f32[2,4,128], index: 2, kind: output, shape index: {}]  }
   0x1   :  { %9 = vsyncpa [#allocation3 + $0x1], 0 }
   0x2   :  { %10 = vsyncpa [#allocation6], 0 }
   0x3   :  { %12 = vsyncpa [#allocation6 + $0x1], 0 }
   0x4   :  { %13 = vsyncpa [#allocation4], 0 }
   0x5   :  { %15 = vsyncpa [#allocation4 + $0x1], 0  ;;  %s713_s9 = smov 0   ;;  %s715_s10 = smov 0  }
   0x6   :  { %s717_s11 = smov 0   ;;  %s719_s12 = smov 0  }
   0x7   :  { %s721_s13 = smov 0   ;;  %s723_s14 = smov 0  }
   0x8 LB: > { %s449_s15 = sadd.s32 4294967295, %s692_s14   ;;  %s450_s16 = sadd.s32 4294967294, %s692_s14   ;;  %s692_s14 = sphi %s723_s14, %s21_s14   ;;  %s688_s13 = sphi %s721_s13, %s970_s13   ;;  %s684_s12 = sphi %s719_s12, %s969_s12   ;;  %s680_s11 = sphi %s717_s11, %s968_s11   ;;  %s676_s10 = sphi %s715_s10, %s967_s10   ;;  %s672_s9 = sphi %s713_s9, %s966_s9  }
   0x9   : > { %s33_s17 = sadd.s32 1, %s688_s13  ;;  %s42_s18 = sadd.s32 1, %s680_s11 }
   0xa   : > { %p35_p0 = scmp.ge.s32.totalorder %s33_s17, 2  ;;  %p49_p1 = scmp.ne.s32.totalorder %s680_s11, %s676_s10 }
   0xb   : > { %p50_p2 = scmp.eq.s32.totalorder %s692_s14, 0  ;;  %p55_p3 = scmp.ne.s32.totalorder %s676_s10, %s672_s9 }
   0xc   : > { %s972_s17 = smov (%p35_p0, %s33_s17), 0  ;;  %p56_p5 = scmp.eq.s32.totalorder %s449_s15, 0 }
   0xd   : > { %p754_p4 = por %p50_p2, %p49_p1  ;;  %s37_s20 = ssub.s32 %s688_s13, %s972_s17 }
   0xe   : > { %p107_p6 = scmp.eq.s32.totalorder %s449_s15, 1  ;;  %p40_p7 = scmp.eq.s32.totalorder %s37_s20, 0 }
   0xf   : > { %p760_p8 = por %p56_p5, %p55_p3  ;;  %p113_p10 = scmp.eq.s32.totalorder %s450_s16, 1 }
  0x10   : > { %p764_p9 = por %p107_p6, %p49_p1  ;;  %p486_p13 = scmp.lt.s32.totalorder %s692_s14, 2 }
  0x11   : > { %s954_s21 = scalar_select %p760_p8, 1, 0 }
  0x12   : > { %s955_s22 = scalar_select %p764_p9, 1, 0 }
  0x13   : > { %s769_s23 = scalar_select %p40_p7, %s680_s11, %s42_s18  }
  0x14   : > { %p771_p11 = por %p113_p10, %p55_p3  ;;  %s778_s25 = sand.u32 1, %s680_s11  }
  0x15   : > { %s453_s26 = sshll.u32 %s778_s25, 3  ;;  %s467_s27 = sshll.u32 %s688_s13, 7 }
  0x16   : > { %s956_s24 = scalar_select %p771_p11, 1, 0 }
  0x17   : > { %s785_s30 = scalar_lea.hbm %s948_s0, %s467_s27  ;;  %s137_s3 = scalar_lea.vmem [#allocation2], %s453_s26 }
  0x18   : > { %s147_s4 = sshll.u32 %s137_s3, 4  ;;  %p791_p0 = pnand %p486_p13, %p754_p4  ;;  %s787_s4 = int_to_ptr.vmem [resolvable:$true] %s147_s4 }
  0x19   : > { %s134_s6 = scalar_lea.sflag [#allocation3], %s778_s25  ;;  %s546_s7 = scalar_lea.hbm %s785_s30, 128 }
  0x1a   : > { %p547_p3 = scmp.ne.s32.totalorder %s785_s30, %s546_s7  ;;  %p548_p5 = pneg %p791_p0 }
  0x1b   : > { %s551_s16 = scalar_lea.hbm %s948_s0, 256  ;;  %p552_p4 = scmp.lt.u32.totalorder %s785_s30, %s948_s0 }
  0x1c   : > { %p549_p6 = pnand %p548_p5, %p547_p3  ;;  %p553_p10 = scmp.lt.u32.totalorder %s551_s16, %s546_s7 }
  0x1d   : > { %p555_p12 = scmp.lt.u32.totalorder %s546_s7, %s785_s30 }
  0x1e   : > { %p550_p7 = pneg %p549_p6  ;;  %p554_p13 = por %p553_p10, %p552_p4 }
  0x20   : > { %p556_p1 = por %p555_p12, %p554_p13 }
  0x22   : > { %p557_p2 = pnand %p556_p1, %p550_p7 }
  0x24   : > { %560 = shalt.err (!%p557_p2)
}
  0x25   : > { %s561_s20 = scalar_lea.vmem %s787_s4, 128  ;;  %s694_s26 = smov [#allocation2]  }
  0x26   : > { %p562_p3 = scmp.ne.s32.totalorder %s787_s4, %s561_s20  ;;  %s566_s27 = sshll.u32 %s694_s26, 4  ;;  %s567_s27 = int_to_ptr.vmem [resolvable:$false] %s566_s27 }
  0x27   : > { %s568_s28 = scalar_lea.vmem %s567_s27, 256  ;;  %p569_p9 = scmp.lt.s32.totalorder %s787_s4, %s567_s27 }
  0x28   : > { %p564_p6 = pnand %p562_p3, %p548_p5  ;;  %p570_p4 = scmp.lt.s32.totalorder %s568_s28, %s561_s20 }
  0x2a   : > { %p565_p11 = pneg %p564_p6  ;;  %p571_p10 = por %p570_p4, %p569_p9 }
  0x2c   : > { %p572_p12 = pnand %p571_p10, %p565_p11 }
  0x2e   : > { %575 = shalt.err (!%p572_p12)
}
  0x2f   : > { %478 = dma.hbm_to_vmem [thread:$0]  (!%p791_p0), %s785_s30, 128, %s787_s4, %s134_s6  }
  0x30   : > { %p958_p1 = scmp.lt.s32.totalorder %s692_s14, 3  ;;  %p959_p2 = scmp.ge.s32.totalorder %s692_s14, 1 }
  0x31   : > { %s456_s3 = sshll.u32 %s778_s25, 1  ;;  %s468_s7 = sshll.u32 %s688_s13, 5 }
  0x32   : > { %p827_p7 = pnand %p959_p2, %p958_p1  ;;  %s836_s16 = scalar_lea.hbm %s949_s1, %s468_s7 }
  0x33   : > { %s158_s18 = scalar_lea.vmem [#allocation5], %s456_s3  ;;  %s155_s30 = scalar_lea.sflag [#allocation6], %s778_s25 }
  0x34   : > { %s960_s29 = scalar_select %p827_p7, 1, 0 }
  0x35   : > { %s168_s19 = sshll.u32 %s158_s18, 4  ;;  %s576_s4 = scalar_lea.hbm %s836_s16, 32  ;;  %s169_s19 = int_to_ptr.vmem [resolvable:$true] %s168_s19 }
  0x36   : > { %p577_p9 = scmp.ne.s32.totalorder %s836_s16, %s576_s4  ;;  %s581_s26 = scalar_lea.hbm %s949_s1, 64 }
  0x37   : > { %p582_p3 = scmp.lt.u32.totalorder %s836_s16, %s949_s1  ;;  %p583_p6 = scmp.lt.u32.totalorder %s581_s26, %s576_s4 }
  0x38   : > { %p579_p11 = pnand %p577_p9, %p548_p5  ;;  %p585_p10 = scmp.lt.u32.totalorder %s576_s4, %s836_s16 }
  0x39   : > { %p584_p4 = por %p583_p6, %p582_p3 }
  0x3a   : > { %p580_p13 = pneg %p579_p11 }
  0x3b   : > { %p586_p12 = por %p585_p10, %p584_p4 }
  0x3d   : > { %p587_p1 = pnand %p586_p12, %p580_p13 }
  0x3f   : > { %590 = shalt.err (!%p587_p1)
}
  0x40   : > { %s591_s25 = scalar_lea.vmem %s169_s19, 32  ;;  %s695_s3 = smov [#allocation5]  }
  0x41   : > { %p592_p2 = scmp.ne.s32.totalorder %s169_s19, %s591_s25  ;;  %s596_s7 = sshll.u32 %s695_s3, 4  ;;  %s597_s7 = int_to_ptr.vmem [resolvable:$false] %s596_s7 }
  0x42   : > { %s598_s8 = scalar_lea.vmem %s597_s7, 64  ;;  %p599_p8 = scmp.lt.s32.totalorder %s169_s19, %s597_s7 }
  0x43   : > { %p594_p9 = pnand %p592_p2, %p548_p5  ;;  %p600_p7 = scmp.lt.s32.totalorder %s598_s8, %s591_s25 }
  0x45   : > { %p595_p11 = pneg %p594_p9  ;;  %p601_p3 = por %p600_p7, %p599_p8 }
  0x47   : > { %p602_p6 = pnand %p601_p3, %p595_p11 }
  0x49   : > { %605 = shalt.err (!%p602_p6)
}
  0x4a   : > { %481 = dma.hbm_to_vmem [thread:$0]  (!%p791_p0), %s836_s16, 32, %s169_s19, %s155_s30  }
  0x4b   : > { %p961_p13 = scmp.ne.s32.totalorder %s960_s29, 0 }
  0x4c   : > { %s861_s15 = sand.u32 (!%p961_p13), 1, %s676_s10   ;;  %p962_p5 = scmp.ne.s32.totalorder (!%p961_p13), %s954_s21, 0 }
  0x4d   : > { %177 = sbr.rel (%p961_p13) target bundleno = 317 (0x13d), region = 28  ;;  %s460_s18 = sshll.u32 (!%p961_p13), %s861_s15, 3 }
  0x4e   : > { %s180_s4 = scalar_lea.sflag (!%p961_p13), [#allocation3], %s861_s15  ;;  %s183_s6 = scalar_lea.vmem (!%p961_p13), [#allocation2], %s460_s18 }
  0x54   : > { %659 = dma.done.wait (%p962_p5), %s180_s4, 128  }
  0x55   : > { %661 = vsyncadd (%p962_p5), %s180_s4, 4294967168  ;;  %s461_s5 = sshll.u32 %s861_s15, 1  ;;  %s189_s29 = scalar_lea.sflag [#allocation6], %s861_s15 }
  0x56   : > { %s871_s16 = scalar_lea.vmem [#allocation5], %s461_s5 }
  0x57   : > { %663 = dma.done.wait (%p962_p5), %s189_s29, 32  }
  0x58   : > { %665 = vsyncadd (%p962_p5), %s189_s29, 4294967264  ;;  %s462_s19 = sshll.u32 %s861_s15, 2  ;;  %v696_v0 = vmov 0.0   ;;  %vm241_vm0 = vcmask 1043456   ;;  %v225_v1 = vld [vmem:[%s183_s6] sm:$0xff]  ;;  %v227_v28 = vlaneseq  ;;  %s464_s21 = sshll.u32 %s684_s12, 6 }
  0x59   : > { %s878_s30 = scalar_lea.vmem [#allocation7], %s462_s19  ;;  %v237_v2 = vcombine.high %v225_v1, %v225_v1  ;;  %v242_v3 = vsel %vm241_vm0, %v225_v1, -inf  ;;  %v226_v39 = vld [vmem:[%s871_s16] sm:$0x3]  ;;  %s898_s28 = scalar_lea.hbm %s950_s2, %s464_s21 }
  0x5a   : > { %224 = vst [vmem:[%s878_s30] sm:$0xf] %v696_v0  ;;  %v243_v4 = vrot.slane %v242_v3, 4  ;;  %v283_v33 = vshrl.u32 %v227_v28, 7  ;;  %v228_v63 = vand.u32 127, %v227_v28  ;;  %s342_s20 = sshll.u32 %s878_s30, 4  ;;  %s329_s25 = scalar_lea.sflag [#allocation4], %s861_s15  ;;  %s900_s20 = int_to_ptr.vmem [resolvable:$true] %s342_s20 }
  0x5b   : > { %v249_v5 = vsel %vm241_vm0, %v237_v2, -inf  ;;  %s606_s3 = scalar_lea.vmem %s900_s20, 64  ;;  %p963_p0 = scmp.ne.s32.totalorder %s955_s22, 0 }
  0x5c   : > { %v244_v6 = vmax.f32 %v242_v3, %v243_v4  ;;  %v250_v7 = vrot.slane %v249_v5, 4  ;;  %v286_v38 = vsub.s32 0, %v283_v33  ;;  %v290_v41 = vsub.s32 1, %v283_v33  ;;  %p607_p8 = scmp.ne.s32.totalorder %s900_s20, %s606_s3  ;;  %s697_s12 = smov [#allocation7]  }
  0x5d   : > { %vm317_vm3 = vcmp.eq.s32.totalorder %v228_v63, 0  ;;  %vm319_vm4 = vcmp.eq.s32.totalorder %v228_v63, 1  ;;  %vm322_vm5 = vcmp.eq.s32.totalorder %v228_v63, 2  ;;  %s610_s7 = sshll.u32 %s697_s12, 4  ;;  %s611_s7 = int_to_ptr.vmem [resolvable:$false] %s610_s7 }
  0x5e   : > { %v245_v8 = vrot.slane %v244_v6, 2  ;;  %v251_v9 = vmax.f32 %v249_v5, %v250_v7  ;;  %v287_v42 = vrot.slane %v226_v39, %v286_v38  ;;  %v291_v43 = vrot.slane %v226_v39, %v290_v41  ;;  %p608_p7 = pnand %p607_p8, %p963_p0  ;;  %s612_s8 = scalar_lea.vmem %s611_s7, 128 }
  0x5f   : > { %p613_p10 = scmp.lt.s32.totalorder %s900_s20, %s611_s7  ;;  %p614_p12 = scmp.lt.s32.totalorder %s612_s8, %s606_s3 }
  0x60   : > { %v246_v10 = vmax.f32 %v244_v6, %v245_v8  ;;  %v252_v11 = vrot.slane %v251_v9, 2  ;;  %vm292_vm1 = vcmp.eq.s32.totalorder %v287_v42, %v283_v33  ;;  %vm293_vm2 = vcmp.eq.s32.totalorder %v291_v43, %v283_v33  ;;  %p609_p4 = pneg %p608_p7 }
  0x61   : > { %v296_v45 = vsel %vm292_vm1, 1.0, %v696_v0  ;;  %v297_v48 = vsel %vm293_vm2, 1.0, %v696_v0  ;;  %v325_v7 = vld [vmem:[%s878_s30] sm:$0xf]  ;;  %p615_p1 = por %p614_p12, %p613_p10 }
  0x62   : > { %v247_v12 = vrot.slane %v246_v10, 1  ;;  %v253_v13 = vmax.f32 %v251_v9, %v252_v11  ;;  %v305_v57 = vsel %vm241_vm0, %v296_v45, 0.0  ;;  %v306_v58 = vsel %vm241_vm0, %v297_v48, 0.0 }
  0x63   : > { %v307_v62 = vadd.f32 %v306_v58, %v305_v57  ;;  %p616_p2 = pnand %p615_p1, %p609_p4 }
  0x64   : > { %v248_v14 = vmax.f32 %v246_v10, %v247_v12  ;;  %v254_v15 = vrot.slane %v253_v13, 1 }
  0x66   : > { %v255_v16 = vmax.f32 %v253_v13, %v254_v15  ;;  %v256_v17 = vsub.f32 %v225_v1, %v248_v14 }
  0x68   : > { %v257_v18 = vsub.f32 %v237_v2, %v255_v16  ;;  %v258_v19 = vmul.f32 1.442695, %v256_v17 }
  0x6a   : > { %538 = vpow2.f32 %v258_v19  ;;  %v260_v20 = vmul.f32 1.442695, %v257_v18 }
  0x6c   : > { %540 = vpow2.f32 %v260_v20 }
  0x74   : > { %v539_v21 = vpop.eup %538 }
  0x75   : > { %v262_v22 = vsel %vm241_vm0, %v539_v21, 0.0 }
  0x76   : > { %v541_v23 = vpop.eup %540  ;;  %v263_v24 = vrot.slane %v262_v22, 4 }
  0x77   : > { %v269_v25 = vsel %vm241_vm0, %v541_v23, 0.0 }
  0x78   : > { %v264_v26 = vadd.f32 %v263_v24, %v262_v22  ;;  %v270_v27 = vrot.slane %v269_v25, 4 }
  0x7a   : > { %v265_v29 = vrot.slane %v264_v26, 2  ;;  %v271_v30 = vadd.f32 %v270_v27, %v269_v25 }
  0x7c   : > { %v266_v31 = vadd.f32 %v265_v29, %v264_v26  ;;  %v272_v32 = vrot.slane %v271_v30, 2 }
  0x7e   : > { %v267_v34 = vrot.slane %v266_v31, 1  ;;  %v273_v35 = vadd.f32 %v272_v32, %v271_v30 }
  0x80   : > { %v268_v36 = vadd.f32 %v267_v34, %v266_v31  ;;  %v274_v37 = vrot.slane %v273_v35, 1 }
  0x82   : > { %v275_v40 = vadd.f32 %v274_v37, %v273_v35  ;;  %542 = vrcp.f32 %v268_v36 }
  0x84   : > { %544 = vrcp.f32 %v275_v40 }
  0x8c   : > { %v543_v44 = vpop.eup %542 }
  0x8d   : > { %v277_v46 = vmul.f32 %v543_v44, %v539_v21 }
  0x8e   : > { %v545_v47 = vpop.eup %544 }
  0x8f   : > { %v279_v49 = vmul.f32 %v545_v47, %v541_v23  ;;  %v298_v50 = vmul.f32 %v296_v45, %v277_v46  ;;  %v310_v51 = vmul.f32 %v277_v46, %v277_v46 }
  0x91   : > { %v299_v52 = vmul.f32 %v297_v48, %v279_v49  ;;  %v300_v53 = vsel %vm241_vm0, %v298_v50, 0.0  ;;  %v311_v54 = vmul.f32 %v279_v49, %v279_v49  ;;  %v312_v55 = vsel %vm241_vm0, %v310_v51, 0.0 }
  0x93   : > { %v301_v56 = vsel %vm241_vm0, %v299_v52, 0.0  ;;  %v313_v59 = vsel %vm241_vm0, %v311_v54, 0.0 }
  0x94   : > { %v302_v60 = vadd.f32 %v301_v56, %v300_v53  ;;  %v314_v61 = vadd.f32 %v313_v59, %v312_v55 }
  0x96   : > { %303 = vadd.xlane.f32.xlu0 %v302_v60  ;;  %315 = vadd.xlane.f32.xlu1 %v314_v61 }
  0x9a   : > { %308 = vadd.xlane.f32.xlu0 %v307_v62 }
 0x123   : > { %v304_v0 = vpop.xlane.xlu0 %303  ;;  %v316_v1 = vpop.xlane.xlu1 %315 }
 0x124   : > { %v318_v3 = vsel %vm317_vm3, %v304_v0, 0.0  ;;  %v323_v5 = vsel %vm322_vm5, %v316_v1, 0.0 }
 0x127   : > { %v309_v2 = vpop.xlane.xlu0 %308 }
 0x128   : > { %v320_v4 = vsel %vm319_vm4, %v309_v2, 0.0 }
 0x129   : > { %v321_v6 = vadd.f32 %v320_v4, %v318_v3 }
 0x12b   : > { %v324_v8 = vadd.f32 %v323_v5, %v321_v6 }
 0x12d   : > { %v326_v9 = vadd.f32 %v325_v7, %v324_v8 }
 0x12f   : > { %327 = vst [vmem:[%s878_s30] sm:$0xf] %v326_v9 }
 0x130   : > { %619 = shalt.err (!%p616_p2)
}
 0x131   : > { %s620_s15 = scalar_lea.hbm %s898_s28, 64  ;;  %s624_s6 = scalar_lea.hbm %s950_s2, 128 }
 0x132   : > { %p621_p9 = scmp.ne.s32.totalorder %s898_s28, %s620_s15  ;;  %p625_p6 = scmp.lt.u32.totalorder %s898_s28, %s950_s2 }
 0x133   : > { %p626_p13 = scmp.lt.u32.totalorder %s624_s6, %s620_s15  ;;  %p628_p8 = scmp.lt.u32.totalorder %s620_s15, %s898_s28 }
 0x134   : > { %p622_p11 = pnand %p621_p9, %p963_p0 }
 0x135   : > { %p627_p5 = por %p626_p13, %p625_p6 }
 0x136   : > { %p623_p3 = pneg %p622_p11 }
 0x137   : > { %p629_p7 = por %p628_p8, %p627_p5 }
 0x139   : > { %p630_p4 = pnand %p629_p7, %p623_p3 }
 0x13b   : > { %633 = shalt.err (!%p630_p4)
}
 0x13c   : > { %473 = dma.vmem_to_hbm [thread:$0]  (%p963_p0), %s900_s20, 64, %s898_s28, %s329_s25  }
 0x13d PF: > { %s354_s16 = sand.u32 1, %s672_s9   ;;  %p964_p10 = scmp.ne.s32.totalorder %s956_s24, 0 }
 0x13e   : > { %p965_p12 = scmp.ge.s32.totalorder %s692_s14, 2  ;;  %s355_s19 = scalar_lea.sflag [#allocation4], %s354_s16 }
 0x140   : > { %p483_p1 = pnand %p965_p12, %p964_p10 }
 0x142   : > { %667 = dma.done.wait (!%p483_p1), %s355_s19, 64  }
 0x143   : > { %669 = vsyncadd (!%p483_p1), %s355_s19, 4294967232  ;;  %s21_s14 = sadd.s32 1, %s692_s14   ;;  %s966_s9 = smov %s676_s10 }
 0x144   : > { %p18_p2 = scmp.ge.s32.totalorder %s21_s14, 4   ;;  %s967_s10 = smov %s680_s11 }
 0x145   : > { %s968_s11 = smov %s769_s23  ;;  %s969_s12 = smov %s688_s13 }
 0x146   : > { %s970_s13 = smov %s972_s17  ;;  %20 = sbr.rel (!%p18_p2) target bundleno = 8 (0x8), region = 90 }
 0x14d   :  { %360 = vsyncpa [#allocation3], 1 }
 0x14e   :  { %362 = vsyncpa [#allocation3 + $0x1], 1 }
 0x14f   :  { %363 = vsyncpa [#allocation6], 1 }
 0x150   :  { %365 = vsyncpa [#allocation6 + $0x1], 1 }
 0x151   :  { %366 = vsyncpa [#allocation4], 1 }
 0x152   :  { %368 = vsyncpa [#allocation4 + $0x1], 1 }

</bundles_post_ra>
